<compile_context>
chip_gen: v7x
topology: tpu7x:2x2x1
jax: 0.10.0
libtpu: 0.0.40
codegen_flags: <defaults>
</compile_context>

<pallas_src>
import functools

import jax
import jax.numpy as jnp
from jax.experimental import pallas as pl
from jax.experimental.pallas import tpu as pltpu


# ----------------------------- Pallas kernel -------------------------------

def _std_pool_kernel(x_ref, o_ref):
    """Per-row unbiased std over the last axis of one (tr, L) tile."""
    x = x_ref[...].astype(jnp.float32)                     # (tr, L)
    L = x.shape[1]
    mean = jnp.sum(x, axis=1, keepdims=True) * (1.0 / L)   # (tr, 1)
    d = x - mean
    var = jnp.sum(d * d, axis=1, keepdims=True) * (1.0 / (L - 1))
    std = jnp.sqrt(jnp.maximum(var, 0.0))                  # guard tiny negatives
    o_ref[...] = std.astype(o_ref.dtype)


# ------------------------------- wrapper ------------------------------------

@jax.jit
def std_pool_forward(x):
    """StdPool forward: x (N, C, H, W) -> (N, C, 1, 1) unbiased spatial std."""
    N, C, H, W = x.shape
    R = N * C
    L = H * W

    x2 = x.reshape(R, L)                      # pure reshape on contiguous NCHW

    # Row-tile: multiple of 8 sublanes, no larger than the (padded) row count,
    # and sized so one buffer stays well under a few MiB of VMEM.
    r8 = ((R + 7) // 8) * 8
    row_bytes = L * x.dtype.itemsize
    vmem_rows = max(8, ((4 << 20) // max(row_bytes, 1)) // 8 * 8)
    tr = max(8, min(r8, 1024, vmem_rows))
    Rp = ((R + tr - 1) // tr) * tr
    if Rp != R:                               # zero rows -> std 0, sliced off
        x2 = jnp.pad(x2, ((0, Rp - R), (0, 0)))

    out_flat = pl.pallas_call(
        _std_pool_kernel,
        out_shape=jax.ShapeDtypeStruct((Rp, 1), x.dtype),
        grid_spec=pltpu.PrefetchScalarGridSpec(
            num_scalar_prefetch=0,
            grid=(Rp // tr,),
            in_specs=[
                # full spatial extent on the lane axis (full-dim block, no pad)
                pl.BlockSpec((tr, L), lambda i: (i, 0)),
            ],
            out_specs=pl.BlockSpec((tr, 1), lambda i: (i, 0)),
        ),
        compiler_params=pltpu.CompilerParams(
            dimension_semantics=("parallel",)),
    )(x2)

    return out_flat[:R].reshape(N, C, 1, 1)


# --------------------------------- main -------------------------------------

if __name__ == "__main__":
    N, C, H, W = 2, 4, 16, 16

    key = jax.random.PRNGKey(0)
    x = jax.random.normal(key, (N, C, H, W), dtype=jnp.float32)

    out = std_pool_forward(x)
    out = jax.block_until_ready(out)

    # ---- pure-JAX reference (torch .std default: unbiased, correction=1) ----
    ref = jnp.std(x.reshape(N, C, -1), axis=2, ddof=1).reshape(N, C, 1, 1)

    assert out.shape == (N, C, 1, 1), out.shape
    assert jnp.allclose(out, ref, rtol=1e-5, atol=1e-5), float(
        jnp.max(jnp.abs(out - ref)))
    print("KERNEL_OK")
</pallas_src>

<mosaic_0001>
module attributes {stable_mosaic.version = 11 : i64} {
  func.func @_std_pool_kernel(%arg0: i32, %arg1: memref<8x256xf32, #tpu.memory_space<vmem>>, %arg2: memref<8x1xf32, #tpu.memory_space<vmem>>) attributes {dimension_semantics = [#tpu.dimension_semantics<parallel>], iteration_bounds = array<i64: 1>, scalar_prefetch = 0 : i64, scratch_operands = 0 : i64, tpu.core_type = #tpu.core_type<tc>, window_params = [{transform_indices = @transform_0, window_bounds = array<i64: 8, 256>}, {transform_indices = @transform_1, window_bounds = array<i64: 8, 1>}]} {
    %c0 = arith.constant 0 : index
    %c0_0 = arith.constant 0 : index
    %0 = vector.load %arg1[%c0, %c0_0] : memref<8x256xf32, #tpu.memory_space<vmem>>, vector<8x256xf32>
    %cst = arith.constant dense<0.000000e+00> : vector<8xf32>
    %1 = vector.multi_reduction <add>, %0, %cst [1] : vector<8x256xf32> to vector<8xf32>
    %2 = vector.shape_cast %1 : vector<8xf32> to vector<8x1xf32>
    %cst_1 = arith.constant 3.906250e-03 : f32
    %3 = vector.broadcast %cst_1 : f32 to vector<8x1xf32>
    %4 = arith.mulf %2, %3 : vector<8x1xf32>
    %5 = vector.broadcast %4 : vector<8x1xf32> to vector<8x256xf32>
    %6 = arith.subf %0, %5 : vector<8x256xf32>
    %7 = arith.mulf %6, %6 : vector<8x256xf32>
    %cst_2 = arith.constant dense<0.000000e+00> : vector<8xf32>
    %8 = vector.multi_reduction <add>, %7, %cst_2 [1] : vector<8x256xf32> to vector<8xf32>
    %9 = vector.shape_cast %8 : vector<8xf32> to vector<8x1xf32>
    %cst_3 = arith.constant 0.00392156886 : f32
    %10 = vector.broadcast %cst_3 : f32 to vector<8x1xf32>
    %11 = arith.mulf %9, %10 : vector<8x1xf32>
    %cst_4 = arith.constant 0.000000e+00 : f32
    %12 = vector.broadcast %cst_4 : f32 to vector<8x1xf32>
    %13 = arith.maximumf %11, %12 : vector<8x1xf32>
    %14 = math.sqrt %13 : vector<8x1xf32>
    %c0_5 = arith.constant 0 : index
    %c0_6 = arith.constant 0 : index
    %15 = vector.load %arg2[%c0_5, %c0_6] : memref<8x1xf32, #tpu.memory_space<vmem>>, vector<8x1xf32>
    tpu.vector_store %arg2[%c0_5, %c0_6], %14 {strides = array<i32>} : memref<8x1xf32, #tpu.memory_space<vmem>>, vector<8x1xf32>,
    return
  }
  func.func @transform_0(%arg0: i32) -> (i32, i32) {
    %c0_i32 = arith.constant 0 : i32
    %c0_i32_0 = arith.constant 0 : i32
    return %arg0, %c0_i32 : i32, i32
  }
  func.func @transform_1(%arg0: i32) -> (i32, i32) {
    %c0_i32 = arith.constant 0 : i32
    %c0_i32_0 = arith.constant 0 : i32
    return %arg0, %c0_i32 : i32, i32
  }
}

</mosaic_0001>

<bundles_post_ra>
// kernel: std_pool_forward.1
= control target key start
LH: loop header
LB: loop body
LE: loop exit
PB: predicated region body
PF: predicated region fallthrough
CT: control target
= control target key end

     0   :  { %vm30_vm0 = vcmask 7168   ;;  %s57_s0 = inlined_call_operand.vmem [shape: f32[8,256], index: 0, kind: input, shape index: {}]   ;;  %s58_s1 = inlined_call_operand.vmem [shape: f32[8,1], index: 1, kind: output, shape index: {}]  }
   0x1   :  { %v8_v0 = vld [vmem:[%s57_s0] sm:$0xff]  ;;  %v9_v1 = vld [vmem:[%s57_s0 + $0x8] sm:$0xff] }
   0x2   :  { %v10_v2 = vadd.f32 %v9_v1, %v8_v0 }
   0x4   :  { %11 = vadd.xlane.f32.xlu0 %v10_v2 }
  0x91   :  { %v12_v3 = vpop.xlane.xlu0 %11 }
  0x92   :  { %v13_v4 = vmul.f32 0.00390625, %v12_v3 }
  0x94   :  { %v14_v5 = vsub.f32 %v8_v0, %v13_v4  ;;  %v15_v6 = vsub.f32 %v9_v1, %v13_v4 }
  0x96   :  { %v16_v7 = vmul.f32 %v14_v5, %v14_v5  ;;  %v17_v8 = vmul.f32 %v15_v6, %v15_v6 }
  0x98   :  { %v18_v9 = vadd.f32 %v17_v8, %v16_v7 }
  0x9a   :  { %19 = vadd.xlane.f32.xlu0 %v18_v9 }
 0x127   :  { %v20_v10 = vpop.xlane.xlu0 %19 }
 0x128   :  { %v21_v11 = vmul.f32 0.003921569, %v20_v10 }
 0x12a   :  { %v22_v12 = vmax.f32 %v21_v11, 0.0 }
 0x12c   :  { %36 = vrsqrt.f32 %v22_v12  ;;  %vm25_vm1 = vcmp.eq.f32.partialorder %v22_v12, inf  ;;  %v28_v15 = vand.u32 2147483648, %v22_v12  ;;  %vm27_vm2 = vcmp.eq.f32.partialorder %v22_v12, 0.0 }
 0x136   :  { %v37_v13 = vpop.eup %36 }
 0x137   :  { %v24_v14 = vmul.f32 %v37_v13, %v22_v12 }
 0x139   :  { %v26_v16 = vsel %vm25_vm1, %v22_v12, %v24_v14 }
 0x13a   :  { %v29_v17 = vsel %vm27_vm2, %v28_v15, %v26_v16 }
 0x13b   :  { %31 = vst.msk [vmem:[%s58_s1] sm:$0xff] %vm30_vm0, %v29_v17 }

</bundles_post_ra>
